<compile_context>
chip_gen: v5e
topology: v5e:2x2
jax: 0.10.0
libtpu: 0.0.40
codegen_flags: <defaults>
</compile_context>

<pallas_src>
import functools

import jax
import jax.numpy as jnp
from jax.experimental import pallas as pl
from jax.experimental.pallas import tpu as pltpu


def _net1_kernel(x_ref, w1_ref, b1_ref, e_ref, w2_ref, b2_ref, xo_ref, eo_ref):
    """Two independent row-tiled matmuls (MXU) + bias adds (VPU), fused."""
    hi = jax.lax.Precision.HIGHEST
    xo_ref[...] = (
        jnp.dot(x_ref[...], w1_ref[...], precision=hi,
                preferred_element_type=jnp.float32)
        + b1_ref[...]
    ).astype(xo_ref.dtype)
    eo_ref[...] = (
        jnp.dot(e_ref[...], w2_ref[...], precision=hi,
                preferred_element_type=jnp.float32)
        + b2_ref[...]
    ).astype(eo_ref.dtype)


def _round_up(v: int, m: int) -> int:
    return (v + m - 1) // m * m


def net1_forward(params, x: jax.Array, edge_attr: jax.Array, *, tm: int = 8192):
    """Fused forward: (x @ W1 + b1, edge_attr @ W2 + b2)."""
    (w1, b1), (w2, b2) = params
    mx, kx = x.shape
    me, ke = edge_attr.shape
    n1, n2 = w1.shape[1], w2.shape[1]

    def branch_tile(m: int) -> int:
        # Large row tile to amortize per-grid-step overhead, capped at ~half of
        # this branch's rows so substantial branches get >=2 balanced tiles
        # (dual-TensorCore sharding on v7x).  Always a multiple of 8 sublanes.
        return max(8, min(tm, _round_up(pl.cdiv(m, 2), 8)))

    tm_x, tm_e = branch_tile(mx), branch_tile(me)
    nbx = pl.cdiv(mx, tm_x)   # row blocks of the lin1 branch
    nbe = pl.cdiv(me, tm_e)   # row blocks of the lin2 branch
    num_tiles = max(nbx, nbe)

    def row_map(nb: int):
        if nb == num_tiles:
            return lambda i: (i, 0)
        # Shorter branch: clamp to its last valid block.  The repeated block
        # index skips the input re-DMA, and recomputing/rewriting the same
        # block is idempotent, so no extra HBM traffic and safe under
        # per-TensorCore grid sharding.
        return lambda i: (jnp.minimum(i, nb - 1), 0)

    const_map = lambda i: (0, 0)   # weights & biases stay VMEM-resident

    xo, eo = pl.pallas_call(
        _net1_kernel,
        out_shape=(
            jax.ShapeDtypeStruct((mx, n1), x.dtype),
            jax.ShapeDtypeStruct((me, n2), edge_attr.dtype),
        ),
        grid=(num_tiles,),
        in_specs=[
            pl.BlockSpec((tm_x, kx), row_map(nbx)),
            pl.BlockSpec((kx, n1), const_map),
            pl.BlockSpec((1, n1), const_map),
            pl.BlockSpec((tm_e, ke), row_map(nbe)),
            pl.BlockSpec((ke, n2), const_map),
            pl.BlockSpec((1, n2), const_map),
        ],
        out_specs=(
            pl.BlockSpec((tm_x, n1), row_map(nbx)),
            pl.BlockSpec((tm_e, n2), row_map(nbe)),
        ),
        compiler_params=pltpu.CompilerParams(
            dimension_semantics=("parallel",),  # row tiles are independent
        ),
    )(x, w1, b1, edge_attr, w2, b2)

    return xo, eo


def init_linear_params(key, in_features: int, out_features: int):
    """Deterministic PyTorch-style init: U(-1/sqrt(in), 1/sqrt(in))."""
    kw, kb = jax.random.split(key)
    bound = 1.0 / jnp.sqrt(jnp.float32(in_features))
    # Stored as [in, out] so the kernel computes x @ W directly.
    w = jax.random.uniform(
        kw, (in_features, out_features), jnp.float32, -bound, bound
    )
    b = jax.random.uniform(kb, (1, out_features), jnp.float32, -bound, bound)
    return w, b


if __name__ == "__main__":
    key = jax.random.PRNGKey(0)
    k_p1, k_p2, k_x, k_e, k_x2, k_e2, k_x3 = jax.random.split(key, 7)

    # Parameters matching Linear(16, 32) and Linear(8, 16).
    params = (
        init_linear_params(k_p1, 16, 32),
        init_linear_params(k_p2, 8, 16),
    )
    (w1, b1), (w2, b2) = params

    fwd = jax.jit(functools.partial(net1_forward, tm=8192))
    hi = jax.lax.Precision.HIGHEST

    # --- Small case (matches the test's graph sizes): 8 nodes, 8 edges. ---
    x = jax.random.normal(k_x, (8, 16), jnp.float32)
    edge_attr = jax.random.normal(k_e, (8, 8), jnp.float32)

    x_out, e_out = fwd(params, x, edge_attr)
    jax.block_until_ready((x_out, e_out))

    assert x_out.shape == (8, 32) and e_out.shape == (8, 16)
    assert jnp.allclose(x_out, jnp.dot(x, w1, precision=hi) + b1,
                        atol=1e-5, rtol=1e-5)
    assert jnp.allclose(e_out, jnp.dot(edge_attr, w2, precision=hi) + b2,
                        atol=1e-5, rtol=1e-5)

    # --- Larger case: multi-tile, unequal rows, ragged last blocks. ---
    xl = jax.random.normal(k_x2, (2000, 16), jnp.float32)
    el = jax.random.normal(k_e2, (4100, 8), jnp.float32)

    xl_out, el_out = fwd(params, xl, el)
    jax.block_until_ready((xl_out, el_out))

    assert xl_out.shape == (2000, 32) and el_out.shape == (4100, 16)
    assert jnp.allclose(xl_out, jnp.dot(xl, w1, precision=hi) + b1,
                        atol=1e-4, rtol=1e-4)
    assert jnp.allclose(el_out, jnp.dot(el, w2, precision=hi) + b2,
                        atol=1e-4, rtol=1e-4)

    # --- Very unequal rows: exercises the clamped-index-map path. ---
    xs = jax.random.normal(k_x3, (8, 16), jnp.float32)
    xs_out, el_out2 = fwd(params, xs, el)
    jax.block_until_ready((xs_out, el_out2))

    assert xs_out.shape == (8, 32) and el_out2.shape == (4100, 16)
    assert jnp.allclose(xs_out, jnp.dot(xs, w1, precision=hi) + b1,
                        atol=1e-5, rtol=1e-5)
    assert jnp.allclose(el_out2, jnp.dot(el, w2, precision=hi) + b2,
                        atol=1e-4, rtol=1e-4)

    print("KERNEL_OK")
</pallas_src>

<mosaic_0001>
module attributes {stable_mosaic.version = 11 : i64} {
  func.func @_net1_kernel(%arg0: i32, %arg1: memref<8x16xf32, #tpu.memory_space<vmem>>, %arg2: memref<16x32xf32, #tpu.memory_space<vmem>>, %arg3: memref<1x32xf32, #tpu.memory_space<vmem>>, %arg4: memref<8x8xf32, #tpu.memory_space<vmem>>, %arg5: memref<8x16xf32, #tpu.memory_space<vmem>>, %arg6: memref<1x16xf32, #tpu.memory_space<vmem>>, %arg7: memref<8x32xf32, #tpu.memory_space<vmem>>, %arg8: memref<8x16xf32, #tpu.memory_space<vmem>>) attributes {dimension_semantics = [#tpu.dimension_semantics<parallel>], iteration_bounds = array<i64: 1>, scalar_prefetch = 0 : i64, scratch_operands = 0 : i64, tpu.core_type = #tpu.core_type<tc>, window_params = [{transform_indices = @transform_0, window_bounds = array<i64: 8, 16>}, {pipeline_mode = #tpu.pipeline_mode<synchronous>, transform_indices = @transform_1, window_bounds = array<i64: 16, 32>}, {pipeline_mode = #tpu.pipeline_mode<synchronous>, transform_indices = @transform_2, window_bounds = array<i64: 1, 32>}, {transform_indices = @transform_3, window_bounds = array<i64: 8, 8>}, {pipeline_mode = #tpu.pipeline_mode<synchronous>, transform_indices = @transform_4, window_bounds = array<i64: 8, 16>}, {pipeline_mode = #tpu.pipeline_mode<synchronous>, transform_indices = @transform_5, window_bounds = array<i64: 1, 16>}, {transform_indices = @transform_6, window_bounds = array<i64: 8, 32>}, {transform_indices = @transform_7, window_bounds = array<i64: 8, 16>}]} {
    %c0 = arith.constant 0 : index
    %c0_0 = arith.constant 0 : index
    %0 = vector.load %arg1[%c0, %c0_0] : memref<8x16xf32, #tpu.memory_space<vmem>>, vector<8x16xf32>
    %c0_1 = arith.constant 0 : index
    %c0_2 = arith.constant 0 : index
    %1 = vector.load %arg2[%c0_1, %c0_2] : memref<16x32xf32, #tpu.memory_space<vmem>>, vector<16x32xf32>
    %cst = arith.constant dense<0.000000e+00> : vector<8x32xf32>
    %2 = tpu.matmul %0, %1, %cst {dimension_numbers = #tpu.dot_dimension_numbers<[1], [0], [0], [1], [0, 0, 1, 1], [], []>, precision = #tpu.contract_precision<fp32>} : vector<8x16xf32>, vector<16x32xf32>, vector<8x32xf32> -> vector<8x32xf32>
    %c0_3 = arith.constant 0 : index
    %c0_4 = arith.constant 0 : index
    %3 = vector.load %arg3[%c0_3, %c0_4] : memref<1x32xf32, #tpu.memory_space<vmem>>, vector<1x32xf32>
    %4 = vector.broadcast %3 : vector<1x32xf32> to vector<8x32xf32>
    %5 = arith.addf %2, %4 : vector<8x32xf32>
    %c0_5 = arith.constant 0 : index
    %c0_6 = arith.constant 0 : index
    %6 = vector.load %arg7[%c0_5, %c0_6] : memref<8x32xf32, #tpu.memory_space<vmem>>, vector<8x32xf32>
    tpu.vector_store %arg7[%c0_5, %c0_6], %5 {strides = array<i32>} : memref<8x32xf32, #tpu.memory_space<vmem>>, vector<8x32xf32>,
    %c0_7 = arith.constant 0 : index
    %c0_8 = arith.constant 0 : index
    %7 = vector.load %arg4[%c0_7, %c0_8] : memref<8x8xf32, #tpu.memory_space<vmem>>, vector<8x8xf32>
    %c0_9 = arith.constant 0 : index
    %c0_10 = arith.constant 0 : index
    %8 = vector.load %arg5[%c0_9, %c0_10] : memref<8x16xf32, #tpu.memory_space<vmem>>, vector<8x16xf32>
    %cst_11 = arith.constant dense<0.000000e+00> : vector<8x16xf32>
    %9 = tpu.matmul %7, %8, %cst_11 {dimension_numbers = #tpu.dot_dimension_numbers<[1], [0], [0], [1], [0, 0, 1, 1], [], []>, precision = #tpu.contract_precision<fp32>} : vector<8x8xf32>, vector<8x16xf32>, vector<8x16xf32> -> vector<8x16xf32>
    %c0_12 = arith.constant 0 : index
    %c0_13 = arith.constant 0 : index
    %10 = vector.load %arg6[%c0_12, %c0_13] : memref<1x16xf32, #tpu.memory_space<vmem>>, vector<1x16xf32>
    %11 = vector.broadcast %10 : vector<1x16xf32> to vector<8x16xf32>
    %12 = arith.addf %9, %11 : vector<8x16xf32>
    %c0_14 = arith.constant 0 : index
    %c0_15 = arith.constant 0 : index
    %13 = vector.load %arg8[%c0_14, %c0_15] : memref<8x16xf32, #tpu.memory_space<vmem>>, vector<8x16xf32>
    tpu.vector_store %arg8[%c0_14, %c0_15], %12 {strides = array<i32>} : memref<8x16xf32, #tpu.memory_space<vmem>>, vector<8x16xf32>,
    return
  }
  func.func @transform_0(%arg0: i32) -> (i32, i32) {
    %c0_i32 = arith.constant 0 : i32
    %c0_i32_0 = arith.constant 0 : i32
    return %arg0, %c0_i32 : i32, i32
  }
  func.func @transform_1(%arg0: i32) -> (i32, i32) {
    %c0_i32 = arith.constant 0 : i32
    %c0_i32_0 = arith.constant 0 : i32
    %c0_i32_1 = arith.constant 0 : i32
    return %c0_i32, %c0_i32_0 : i32, i32
  }
  func.func @transform_2(%arg0: i32) -> (i32, i32) {
    %c0_i32 = arith.constant 0 : i32
    %c0_i32_0 = arith.constant 0 : i32
    %c0_i32_1 = arith.constant 0 : i32
    return %c0_i32, %c0_i32_0 : i32, i32
  }
  func.func @transform_3(%arg0: i32) -> (i32, i32) {
    %c0_i32 = arith.constant 0 : i32
    %c0_i32_0 = arith.constant 0 : i32
    return %arg0, %c0_i32 : i32, i32
  }
  func.func @transform_4(%arg0: i32) -> (i32, i32) {
    %c0_i32 = arith.constant 0 : i32
    %c0_i32_0 = arith.constant 0 : i32
    %c0_i32_1 = arith.constant 0 : i32
    return %c0_i32, %c0_i32_0 : i32, i32
  }
  func.func @transform_5(%arg0: i32) -> (i32, i32) {
    %c0_i32 = arith.constant 0 : i32
    %c0_i32_0 = arith.constant 0 : i32
    %c0_i32_1 = arith.constant 0 : i32
    return %c0_i32, %c0_i32_0 : i32, i32
  }
  func.func @transform_6(%arg0: i32) -> (i32, i32) {
    %c0_i32 = arith.constant 0 : i32
    %c0_i32_0 = arith.constant 0 : i32
    return %arg0, %c0_i32 : i32, i32
  }
  func.func @transform_7(%arg0: i32) -> (i32, i32) {
    %c0_i32 = arith.constant 0 : i32
    %c0_i32_0 = arith.constant 0 : i32
    return %arg0, %c0_i32 : i32, i32
  }
}

</mosaic_0001>

<bundles_post_ra>
// kernel: net1_forward.1
= control target key start
LH: loop header
LB: loop body
LE: loop exit
PB: predicated region body
PF: predicated region fallthrough
CT: control target
= control target key end

     0   :  { %13 = vsyncpa [#allocation3], 0  ;;  %s725_s0 = inlined_call_operand.hbm [shape: f32[8,16], index: 0, kind: input, shape index: {}]   ;;  %s726_s1 = inlined_call_operand.hbm [shape: f32[16,32], index: 1, kind: input, shape index: {}]   ;;  %s727_s2 = inlined_call_operand.hbm [shape: f32[1,32], index: 2, kind: input, shape index: {}]   ;;  %s728_s3 = inlined_call_operand.hbm [shape: f32[8,8], index: 3, kind: input, shape index: {}]   ;;  %s729_s4 = inlined_call_operand.hbm [shape: f32[8,16], index: 4, kind: input, shape index: {}]   ;;  %s730_s5 = inlined_call_operand.vmem [shape: f32[1,16], index: 5, kind: input, shape index: {}]   ;;  %s731_s6 = inlined_call_operand.hbm [shape: f32[8,32], index: 6, kind: output, shape index: {0}]   ;;  %s732_s7 = inlined_call_operand.hbm [shape: f32[8,16], index: 7, kind: output, shape index: {1}]  }
   0x1   :  { %14 = vsyncpa [#allocation6], 0 }
   0x2   :  { %15 = vsyncpa [#allocation9], 0 }
   0x3   :  { %16 = vsyncpa [#allocation4], 0  ;;  %s33_s26 = sshll.u32 %s726_s1, 4  ;;  %s34_s26 = int_to_ptr.hbm [resolvable:$true] %s33_s26 }
   0x4   :  { %17 = vsyncpa [#allocation13], 0  ;;  %s650_s27 = smov [#allocation5]   ;;  %s58_s8 = sshll.u32 %s728_s3, 4  ;;  %s59_s8 = int_to_ptr.hbm [resolvable:$true] %s58_s8 }
   0x5   :  { %s35_s28 = sshll.u32 %s650_s27, 4  ;;  %s651_s9 = smov 128   ;;  %s36_s28 = int_to_ptr.vmem [resolvable:$true] %s35_s28 }
   0x6   :  { %s652_s10 = smov 8   ;;  %s653_s11 = smov [#allocation8]  }
   0x7   :  { %41 = dma.hbm_to_vmem [thread:$0]  %s34_s26, 256, %s36_s28, [#allocation6], %s651_s9, %s651_s9, %s652_s10  }
   0x8   :  { %s60_s12 = sshll.u32 %s653_s11, 4  ;;  %s23_s15 = sshll.u32 %s725_s0, 4  ;;  %s61_s12 = int_to_ptr.vmem [resolvable:$true] %s60_s12  ;;  %s24_s15 = int_to_ptr.hbm [resolvable:$true] %s23_s15 }
   0x9   :  { %63 = dma.hbm_to_vmem [thread:$0]  %s59_s8, 128, %s61_s12, [#allocation9]  }
   0xa   :  { %s47_s17 = sshll.u32 %s727_s2, 4  ;;  %s654_s18 = smov [#allocation2]   ;;  %s48_s17 = int_to_ptr.hbm [resolvable:$true] %s47_s17 }
   0xb   :  { %s25_s19 = sshll.u32 %s654_s18, 4  ;;  %s655_s3 = smov [#allocation7]   ;;  %s26_s19 = int_to_ptr.vmem [resolvable:$true] %s25_s19 }
   0xc   :  { %28 = dma.hbm_to_vmem [thread:$0]  %s24_s15, 128, %s26_s19, [#allocation3]  }
   0xd   :  { %s49_s20 = sshll.u32 %s655_s3, 4  ;;  %s69_s23 = sshll.u32 %s729_s4, 4  ;;  %s50_s20 = int_to_ptr.vmem [resolvable:$true] %s49_s20  ;;  %s70_s23 = int_to_ptr.hbm [resolvable:$true] %s69_s23 }
   0xe   :  { %52 = dma.hbm_to_vmem [thread:$0]  %s48_s17, 16, %s50_s20, [#allocation6]  }
   0xf   :  { %s656_s0 = smov [#allocation10]  }
  0x10   :  { %s71_s24 = sshll.u32 %s656_s0, 4  ;;  %s72_s24 = int_to_ptr.vmem [resolvable:$true] %s71_s24 }
  0x11   :  { %74 = dma.hbm_to_vmem [thread:$0]  %s70_s23, 128, %s72_s24, [#allocation9]  }
  0x12   :  { %640 = dma.done.wait [#allocation3], 128  }
  0x13   :  { %641 = vsyncadd [#allocation3], 4294967168 }
  0x14   :  { %642 = dma.done.wait [#allocation6], 272  }
  0x15   :  { %643 = vsyncadd [#allocation6], 4294967024 }
  0x16   :  { %644 = dma.done.wait [#allocation9], 256  }
  0x17   :  { %645 = vsyncadd [#allocation9], 4294967040  ;;  %vm104_vm0 = vcmask 130048   ;;  %vm275_vm1 = vcmask 64512   ;;  %v99_v0 = vld [vmem:[#allocation5 + $0x8] sm:$0xff]  ;;  %v98_v1 = vld [vmem:[#allocation5] sm:$0xff] }
  0x18   :  { %v97_v2 = vld [vmem:[#allocation2] sm:$0xff]  ;;  %v122_v3 = vand.u32 4294901760, %v99_v0  ;;  %v124_v4 = vand.u32 4294901760, %v98_v1  ;;  %v470_v32 = vld [vmem:[#allocation7] ss:$0 sm:$0xff]  ;;  %s657_s25 = smov [#allocation11]  }
  0x19   :  { %v106_v5 = vsel %vm104_vm0, %v97_v2, 0  ;;  %v270_v6 = vld [vmem:[#allocation10] sm:$0xff]  ;;  %v269_v7 = vld [vmem:[#allocation8] sm:$0xff]  ;;  %s431_s26 = sshll.u32 %s657_s25, 4  ;;  %s433_s29 = sshll.u32 %s731_s6, 4  ;;  %vm267_vm2 = vcmask 261120   ;;  %s432_s26 = int_to_ptr.vmem [resolvable:$true] %s431_s26  ;;  %s434_s29 = int_to_ptr.hbm [resolvable:$true] %s433_s29 }
  0x1a   :  { %v126_v8 = vand.u32 4294901760, %v106_v5  ;;  %v294_v9 = vand.u32 4294901760, %v270_v6  ;;  %v277_v10 = vsel %vm275_vm1, %v269_v7, 0  ;;  %v150_v11 = vsub.f32 %v99_v0, %v122_v3  ;;  %123 = vmatpush.msra.mxu0 %v122_v3  ;;  %207 = vmatpush.msra.mxu3 %v122_v3  ;;  %v471_v41 = vld [vmem:[%s730_s5] ss:$0 sm:$0xff]  ;;  %s658_s5 = smov [#allocation12]  }
  0x1b   :  { %v156_v12 = vsub.f32 %v98_v1, %v124_v4  ;;  %v296_v13 = vand.u32 4294901760, %v277_v10  ;;  %s442_s6 = sshll.u32 %s658_s5, 4  ;;  %s444_s9 = sshll.u32 %s732_s7, 4  ;;  %s443_s6 = int_to_ptr.vmem [resolvable:$true] %s442_s6  ;;  %s445_s9 = int_to_ptr.hbm [resolvable:$true] %s444_s9 }
  0x1c   :  { %v127_v14 = vsub.f32 %v106_v5, %v126_v8  ;;  %v321_v15 = vsub.f32 %v270_v6, %v294_v9  ;;  %182 = vmatpush.msra.mxu2 %v150_v11  ;;  %125 = vmatpush.msra.mxu0 %v124_v4  ;;  %v151_v16 = vand.u32 4294901760, %v150_v11 }
  0x1d   :  { %v157_v17 = vand.u32 4294901760, %v156_v12  ;;  %v297_v18 = vsub.f32 %v277_v10, %v296_v13  ;;  %209 = vmatpush.msra.mxu3 %v124_v4 }
  0x1e   :  { %v128_v19 = vand.u32 4294901760, %v127_v14  ;;  %v322_v20 = vand.u32 4294901760, %v321_v15  ;;  %185 = vmatpush.msra.mxu2 %v156_v12  ;;  %v152_v21 = vsub.f32 %v150_v11, %v151_v16  ;;  %234 = vmatpush.msrb.mxu0 %v151_v16 }
  0x1f   :  { %v158_v22 = vsub.f32 %v156_v12, %v157_v17  ;;  %v298_v23 = vand.u32 4294901760, %v297_v18  ;;  %188 = vmatmul.f32.vlgmr.msra.gmra.mxu2 %v127_v14 }
  0x20   :  { %v129_v24 = vsub.f32 %v127_v14, %v128_v19  ;;  %213 = vmatmul.f32.vlgmr.msra.gmra.mxu3 %v128_v19  ;;  %v323_v25 = vsub.f32 %v321_v15, %v322_v20  ;;  %295 = vmatpush.msrb.mxu2 %v294_v9  ;;  %v153_v26 = vand.u32 4294901760, %v152_v21 }
  0x21   :  { %v159_v27 = vand.u32 4294901760, %v158_v22  ;;  %238 = vmatpush.msrb.mxu0 %v157_v17  ;;  %v299_v28 = vsub.f32 %v297_v18, %v298_v23 }
  0x22   :  { %v130_v29 = vand.u32 4294901760, %v129_v24  ;;  %v324_v30 = vand.u32 4294901760, %v323_v25  ;;  %397 = vmatpush.msra.mxu2 %v322_v20  ;;  %154 = vmatpush.msra.mxu1 %v153_v26 }
  0x23   :  { %v300_v31 = vand.u32 4294901760, %v299_v28 }
  0x24   :  { %131 = vmatmul.f32.vlgmr.msra.gmra.mxu0 %v130_v29  ;;  %325 = vmatpush.msrb.mxu3 %v324_v30 }
  0x25   :  { %160 = vmatpush.msra.mxu1 %v159_v27  ;;  %348 = vmatpush.msra.mxu0 %v321_v15 }
  0x26   :  { %162 = vmatmul.f32.vlgmr.msra.gmra.mxu1 %v126_v8  ;;  %419 = vmatpush.msra.mxu3 %v294_v9 }
  0x27   :  { %259 = vmatpush.msrb.mxu1 %v122_v3  ;;  %301 = vmatmul.f32.vlgmr.msrb.gmra.mxu2 %v300_v31 }
  0x28   :  { %327 = vmatmul.f32.vlgmr.msrb.gmra.mxu3 %v296_v13 }
  0x29   :  { %261 = vmatpush.msrb.mxu1 %v124_v4 }
  0x2b   :  { %371 = vmatpush.msra.mxu1 %v294_v9 }
  0x2c   :  { %240 = vmatmul.f32.vlgmr.msrb.gmra.mxu0 %v126_v8 }
  0x2e   :  { %263 = vmatmul.f32.vlgmr.msrb.gmra.mxu1 %v126_v8 }
  0x2f   :  { %399 = vmatmul.f32.vlgmr.msra.gmra.mxu2 %v296_v13 }
  0x30   :  { %421 = vmatmul.f32.vlgmr.msra.gmra.mxu3 %v296_v13 }
  0x34   :  { %351 = vmatmul.f32.vlgmr.msra.gmra.mxu0 %v297_v18 }
  0x36   :  { %375 = vmatmul.f32.vlgmr.msra.gmra.mxu1 %v298_v23 }
  0xa1   :  { %v132_v33 = vpop.f32.mrf.mxu0 }
  0xa2   :  { %v133_v34 = vadd.f32 %v470_v32, %v132_v33  ;;  %v189_v36 = vpop.f32.mrf.mxu2 }
  0xa3   :  { %v163_v35 = vpop.f32.mrf.mxu1  ;;  %v214_v38 = vpop.f32.mrf.mxu3 }
  0xa4   :  { %v164_v37 = vadd.f32 %v163_v35, %v133_v34 }
  0xa6   :  { %v190_v39 = vadd.f32 %v189_v36, %v164_v37 }
  0xa8   :  { %v215_v40 = vadd.f32 %v214_v38, %v190_v39 }
  0xa9   :  { %v241_v42 = vpop.f32.mrf.mxu0 }
  0xaa   :  { %v242_v43 = vadd.f32 %v241_v42, %v215_v40  ;;  %v302_v45 = vpop.f32.mrf.mxu2 }
  0xab   :  { %v264_v44 = vpop.f32.mrf.mxu1  ;;  %v303_v47 = vadd.f32 %v471_v41, %v302_v45  ;;  %v328_v48 = vpop.f32.mrf.mxu3 }
  0xac   :  { %v265_v46 = vadd.f32 %v264_v44, %v242_v43 }
  0xad   :  { %v329_v49 = vadd.f32 %v328_v48, %v303_v47 }
  0xae   :  { %268 = vst.msk [vmem:[#allocation11] sm:$0xff] %vm267_vm2, %v265_v46 }
  0xaf   :  { %436 = dma.vmem_to_hbm [thread:$0]  %s432_s26, 128, %s434_s29, [#allocation4]  }
  0xb1   :  { %v352_v50 = vpop.f32.mrf.mxu0 }
  0xb2   :  { %v353_v51 = vadd.f32 %v352_v50, %v329_v49  ;;  %v400_v53 = vpop.f32.mrf.mxu2 }
  0xb3   :  { %v376_v52 = vpop.f32.mrf.mxu1  ;;  %v422_v55 = vpop.f32.mrf.mxu3 }
  0xb4   :  { %v377_v54 = vadd.f32 %v376_v52, %v353_v51 }
  0xb6   :  { %v401_v56 = vadd.f32 %v400_v53, %v377_v54 }
  0xb8   :  { %v423_v57 = vadd.f32 %v422_v55, %v401_v56 }
  0xba   :  { %425 = vst.msk [vmem:[#allocation12] sm:$0xff] %vm104_vm0, %v423_v57 }
  0xbb   :  { %447 = dma.vmem_to_hbm [thread:$0]  %s443_s6, 128, %s445_s9, [#allocation13]  }
  0xbc   :  { %646 = dma.done.wait [#allocation4], 128  }
  0xbd   :  { %647 = vsyncadd [#allocation4], 4294967168 }
  0xbe   :  { %648 = dma.done.wait [#allocation13], 128  }
  0xbf   :  { %649 = vsyncadd [#allocation13], 4294967168 }
  0xc0   :  { %456 = vsyncpa [#allocation3], 1 }
  0xc1   :  { %457 = vsyncpa [#allocation6], 1 }
  0xc2   :  { %458 = vsyncpa [#allocation9], 1 }
  0xc3   :  { %459 = vsyncpa [#allocation4], 1 }
  0xc4   :  { %460 = vsyncpa [#allocation13], 1 }

</bundles_post_ra>
